<compile_context>
chip_gen: v5e
topology: v5e:2x2
jax: 0.10.0
libtpu: 0.0.40
codegen_flags: <defaults>
</compile_context>

<pallas_src>
import functools

import jax
import jax.numpy as jnp
from jax.experimental import pallas as pl
from jax.experimental.pallas import tpu as pltpu


def _mlp_kernel(*refs, use_dropout: bool):
    """Fused (Linear -> ReLU -> [Dropout]) x4 -> Linear.

    Ref order: x, (w, b) x 5, [mask x 4 if use_dropout], out.
    """
    if use_dropout:
        (x_ref,
         w_in_ref, b_in_ref, w1_ref, b1_ref, w2_ref, b2_ref,
         w3_ref, b3_ref, w_out_ref, b_out_ref,
         m0_ref, m1_ref, m2_ref, m3_ref, o_ref) = refs
        mask_refs = (m0_ref, m1_ref, m2_ref, m3_ref)
    else:
        (x_ref,
         w_in_ref, b_in_ref, w1_ref, b1_ref, w2_ref, b2_ref,
         w3_ref, b3_ref, w_out_ref, b_out_ref, o_ref) = refs
        mask_refs = (None, None, None, None)

    def hidden_layer(h, w_ref, b_ref, m_ref):
        # bf16 x bf16 MXU matmul, f32 accumulation.  Elementwise math stays f32
        # (v5e-safe: its VPU/EUP have no bf16 support).
        hb = h if h.dtype == jnp.bfloat16 else h.astype(jnp.bfloat16)
        z = jnp.dot(hb, w_ref[...], preferred_element_type=jnp.float32)
        h = jnp.maximum(z + b_ref[...], 0.0)
        if m_ref is not None:
            # Mask already carries the 1/(1-p) scale -> a single multiply.
            h = h * m_ref[...].astype(jnp.float32)
        return h

    h = x_ref[...]                                     # bf16 batch tile
    h = hidden_layer(h, w_in_ref, b_in_ref, mask_refs[0])
    h = hidden_layer(h, w1_ref, b1_ref, mask_refs[1])
    h = hidden_layer(h, w2_ref, b2_ref, mask_refs[2])
    h = hidden_layer(h, w3_ref, b3_ref, mask_refs[3])

    out = jnp.dot(h.astype(jnp.bfloat16), w_out_ref[...],
                  preferred_element_type=jnp.float32) + b_out_ref[...]
    o_ref[...] = out.astype(o_ref.dtype)               # lane-dense (TB, 128k) store


def _round_up(v, m):
    return ((v + m - 1) // m) * m


def _pad2d(a, rows, cols):
    pr, pc = rows - a.shape[0], cols - a.shape[1]
    if pr or pc:
        a = jnp.pad(a, ((0, pr), (0, pc)))
    return a


def simple_net_forward(x, params, *, training=False, drop_p=0.2, seed=0):
    """x: (B, input_size) float32.  params: (in,out) weights & (1,out) biases."""
    assert 0.0 <= drop_p < 1.0, "drop_p must be in [0, 1)"
    B, d_in = x.shape
    d_hidden = params["w_in"].shape[1]
    d_out = params["w_out"].shape[1]

    LANE = 128
    d_in_p = _round_up(d_in, LANE)
    d_h_p = _round_up(d_hidden, LANE)
    d_out_p = _round_up(d_out, LANE)

    # Batch tiling: multiple of 8 sublanes; aim for >=2 grid steps so v7x's
    # second TensorCore and the x-tile DMA pipeline actually engage; cap at 512.
    B8 = _round_up(B, 8)
    TB = max(8, min(512, _round_up(B8 // 2, 8) if B8 >= 16 else B8))
    B_p = _round_up(B, TB)
    nb = B_p // TB

    # bf16 x: halves the per-step HBM->VMEM stream and is MXU-ready.
    x_p = _pad2d(x, B_p, d_in_p).astype(jnp.bfloat16)

    def wpad(w, r, c):              # bf16 weights: half the DMA bytes, MXU-native
        return _pad2d(w, r, c).astype(jnp.bfloat16)

    def bpad(b, c):                 # biases stay f32 (added on the f32 accumulator)
        return _pad2d(b, 1, c).astype(jnp.float32)

    w_in = wpad(params["w_in"], d_in_p, d_h_p); b_in = bpad(params["b_in"], d_h_p)
    w1 = wpad(params["w1"], d_h_p, d_h_p);      b1 = bpad(params["b1"], d_h_p)
    w2 = wpad(params["w2"], d_h_p, d_h_p);      b2 = bpad(params["b2"], d_h_p)
    w3 = wpad(params["w3"], d_h_p, d_h_p);      b3 = bpad(params["b3"], d_h_p)
    w_out = wpad(params["w_out"], d_h_p, d_out_p); b_out = bpad(params["b_out"], d_out_p)

    weights = (w_in, b_in, w1, b1, w2, b2, w3, b3, w_out, b_out)

    use_dropout = training and drop_p > 0.0
    masks = ()
    if use_dropout:
        # TODO(synk): dropout masks are generated host-side with jax.random
        # (bit-exact torch RNG parity is impossible, and in-kernel pltpu PRNG has
        # no CPU/interpret lowering).  Values are {0, 1/(1-p)} so the kernel does
        # exactly one multiply per dropout layer.
        inv_keep = 1.0 / (1.0 - drop_p)
        keys = jax.random.split(jax.random.PRNGKey(seed), 4)
        masks = tuple(
            (jax.random.bernoulli(k, 1.0 - drop_p, (B_p, d_h_p)).astype(jnp.float32)
             * inv_keep).astype(jnp.bfloat16)
            for k in keys)

    # ---- VMEM budget: resident weights + double-buffered streamed tiles ----
    def nbytes(a):
        return a.size * a.dtype.itemsize

    resident_bytes = sum(nbytes(a) for a in weights)
    streamed_bytes = TB * d_in_p * 2 + TB * d_out_p * 4
    if use_dropout:
        streamed_bytes += 4 * TB * d_h_p * 2
    act_bytes = 6 * TB * d_h_p * 4                      # live f32/bf16 activation temps
    vmem_limit = 2 * (2 * streamed_bytes + 2 * resident_bytes + act_bytes) + (8 << 20)
    vmem_limit = int(max(16 << 20, min(vmem_limit, 64 << 20)))
    # TODO(synk): for hidden_size >~ 2048 the fully-resident-weight design overflows
    # v7x's 64 MiB VMEM; it would need per-layer output-column tiling there.

    flops = 2 * B_p * (d_in_p * d_h_p + 3 * d_h_p * d_h_p + d_h_p * d_out_p)
    bytes_accessed = int(nbytes(x_p) + resident_bytes
                         + sum(nbytes(m) for m in masks) + B_p * d_out_p * 4)

    kernel = functools.partial(_mlp_kernel, use_dropout=use_dropout)

    def run(single_buffer_weights):
        def resident(a):
            # Grid-invariant operand (block index (0,0) every step): double
            # buffering it only doubles its VMEM footprint, so request 1 buffer.
            if single_buffer_weights:
                return pl.BlockSpec(a.shape, lambda i: (0, 0),
                                    pipeline_mode=pl.Buffered(1))
            return pl.BlockSpec(a.shape, lambda i: (0, 0))

        in_specs = [pl.BlockSpec((TB, d_in_p), lambda i: (i, 0))]    # x batch tile
        in_specs += [resident(a) for a in weights]
        in_specs += [pl.BlockSpec((TB, d_h_p), lambda i: (i, 0)) for _ in masks]
        out_specs = pl.BlockSpec((TB, d_out_p), lambda i: (i, 0))

        return pl.pallas_call(
            kernel,
            out_shape=jax.ShapeDtypeStruct((B_p, d_out_p), jnp.float32),
            grid_spec=pltpu.PrefetchScalarGridSpec(
                num_scalar_prefetch=0,
                grid=(nb,),
                in_specs=in_specs,
                out_specs=out_specs,
            ),
            compiler_params=pltpu.CompilerParams(
                dimension_semantics=("parallel",),
                vmem_limit_bytes=vmem_limit),
            cost_estimate=pl.CostEstimate(
                flops=flops, transcendentals=0, bytes_accessed=bytes_accessed),
        )(x_p, *weights, *masks)

    try:
        out_p = run(single_buffer_weights=hasattr(pl, "Buffered"))
    except Exception:
        # Older jax / interpret backends may reject pipeline_mode=Buffered(1);
        # retry with default (double-buffered) weight specs.
        out_p = run(single_buffer_weights=False)

    return out_p[:B, :d_out]


def init_params(key, input_size, output_size, hidden_size):
    """Deterministic init mimicking torch.nn.Linear (uniform +-1/sqrt(fan_in)).
    Weights stored transposed: (in_features, out_features)."""
    dims = [
        ("in", input_size, hidden_size),
        ("1", hidden_size, hidden_size),
        ("2", hidden_size, hidden_size),
        ("3", hidden_size, hidden_size),
        ("out", hidden_size, output_size),
    ]
    params = {}
    for name, fan_in, fan_out in dims:
        key, kw, kb = jax.random.split(key, 3)
        bound = 1.0 / (fan_in ** 0.5)
        wname = f"w_{name}" if name in ("in", "out") else f"w{name}"
        bname = f"b_{name}" if name in ("in", "out") else f"b{name}"
        params[wname] = jax.random.uniform(kw, (fan_in, fan_out), jnp.float32, -bound, bound)
        params[bname] = jax.random.uniform(kb, (1, fan_out), jnp.float32, -bound, bound)
    return params


def reference_forward(x, params):
    """Plain-JAX eval-mode reference matching the kernel's numerics:
    bf16 activations/weights at every matmul, f32 accumulation, f32 bias/ReLU."""
    def dot(h, name):
        return jnp.dot(h.astype(jnp.bfloat16),
                       params[name].astype(jnp.bfloat16),
                       preferred_element_type=jnp.float32)
    h = jnp.maximum(dot(x, "w_in") + params["b_in"], 0.0)
    h = jnp.maximum(dot(h, "w1") + params["b1"], 0.0)
    h = jnp.maximum(dot(h, "w2") + params["b2"], 0.0)
    h = jnp.maximum(dot(h, "w3") + params["b3"], 0.0)
    return dot(h, "w_out") + params["b_out"]


if __name__ == "__main__":
    input_size, hidden_size, output_size = 16, 32, 8
    batch = 8

    key = jax.random.PRNGKey(0)
    key, kx = jax.random.split(key)
    x = jax.random.normal(kx, (batch, input_size), jnp.float32)
    params = init_params(key, input_size, output_size, hidden_size)

    # Eval-mode forward (dropout identity) -- matches module.eval().
    y = jax.block_until_ready(simple_net_forward(x, params, training=False))
    y_ref = reference_forward(x, params)
    assert y.shape == (batch, output_size)
    assert jnp.allclose(y, y_ref, atol=1e-3, rtol=1e-3), "mismatch vs reference"

    # Training-mode forward (Bernoulli dropout with 1/(1-p) scaling).
    y_train = jax.block_until_ready(
        simple_net_forward(x, params, training=True, seed=123))
    assert y_train.shape == (batch, output_size)
    assert bool(jnp.all(jnp.isfinite(y_train)))

    print("KERNEL_OK")
</pallas_src>

<mosaic_0001>
module attributes {stable_mosaic.version = 11 : i64} {
  func.func @_mlp_kernel(%arg0: i32, %arg1: memref<8x128xbf16, #tpu.memory_space<vmem>>, %arg2: memref<128x128xbf16, #tpu.memory_space<vmem>>, %arg3: memref<1x128xf32, #tpu.memory_space<vmem>>, %arg4: memref<128x128xbf16, #tpu.memory_space<vmem>>, %arg5: memref<1x128xf32, #tpu.memory_space<vmem>>, %arg6: memref<128x128xbf16, #tpu.memory_space<vmem>>, %arg7: memref<1x128xf32, #tpu.memory_space<vmem>>, %arg8: memref<128x128xbf16, #tpu.memory_space<vmem>>, %arg9: memref<1x128xf32, #tpu.memory_space<vmem>>, %arg10: memref<128x128xbf16, #tpu.memory_space<vmem>>, %arg11: memref<1x128xf32, #tpu.memory_space<vmem>>, %arg12: memref<8x128xf32, #tpu.memory_space<vmem>>) attributes {dimension_semantics = [#tpu.dimension_semantics<parallel>], iteration_bounds = array<i64: 1>, scalar_prefetch = 0 : i64, scratch_operands = 0 : i64, tpu.core_type = #tpu.core_type<tc>, window_params = [{transform_indices = @transform_0, window_bounds = array<i64: 8, 128>}, {pipeline_mode = #tpu.pipeline_mode<synchronous>, transform_indices = @transform_1, window_bounds = array<i64: 128, 128>}, {pipeline_mode = #tpu.pipeline_mode<synchronous>, transform_indices = @transform_2, window_bounds = array<i64: 1, 128>}, {pipeline_mode = #tpu.pipeline_mode<synchronous>, transform_indices = @transform_3, window_bounds = array<i64: 128, 128>}, {pipeline_mode = #tpu.pipeline_mode<synchronous>, transform_indices = @transform_4, window_bounds = array<i64: 1, 128>}, {pipeline_mode = #tpu.pipeline_mode<synchronous>, transform_indices = @transform_5, window_bounds = array<i64: 128, 128>}, {pipeline_mode = #tpu.pipeline_mode<synchronous>, transform_indices = @transform_6, window_bounds = array<i64: 1, 128>}, {pipeline_mode = #tpu.pipeline_mode<synchronous>, transform_indices = @transform_7, window_bounds = array<i64: 128, 128>}, {pipeline_mode = #tpu.pipeline_mode<synchronous>, transform_indices = @transform_8, window_bounds = array<i64: 1, 128>}, {pipeline_mode = #tpu.pipeline_mode<synchronous>, transform_indices = @transform_9, window_bounds = array<i64: 128, 128>}, {pipeline_mode = #tpu.pipeline_mode<synchronous>, transform_indices = @transform_10, window_bounds = array<i64: 1, 128>}, {transform_indices = @transform_11, window_bounds = array<i64: 8, 128>}]} {
    %c0 = arith.constant 0 : index
    %c0_0 = arith.constant 0 : index
    %0 = vector.load %arg1[%c0, %c0_0] : memref<8x128xbf16, #tpu.memory_space<vmem>>, vector<8x128xbf16>
    %c0_1 = arith.constant 0 : index
    %c0_2 = arith.constant 0 : index
    %1 = vector.load %arg2[%c0_1, %c0_2] : memref<128x128xbf16, #tpu.memory_space<vmem>>, vector<128x128xbf16>
    %cst = arith.constant dense<0.000000e+00> : vector<8x128xf32>
    %2 = tpu.matmul %0, %1, %cst {dimension_numbers = #tpu.dot_dimension_numbers<[1], [0], [0], [1], [0, 0, 1, 1], [], []>} : vector<8x128xbf16>, vector<128x128xbf16>, vector<8x128xf32> -> vector<8x128xf32>
    %c0_3 = arith.constant 0 : index
    %c0_4 = arith.constant 0 : index
    %3 = vector.load %arg3[%c0_3, %c0_4] : memref<1x128xf32, #tpu.memory_space<vmem>>, vector<1x128xf32>
    %4 = vector.broadcast %3 : vector<1x128xf32> to vector<8x128xf32>
    %5 = arith.addf %2, %4 : vector<8x128xf32>
    %cst_5 = arith.constant 0.000000e+00 : f32
    %6 = vector.broadcast %cst_5 : f32 to vector<8x128xf32>
    %7 = arith.maximumf %5, %6 : vector<8x128xf32>
    %8 = arith.truncf %7 : vector<8x128xf32> to vector<8x128xbf16>
    %c0_6 = arith.constant 0 : index
    %c0_7 = arith.constant 0 : index
    %9 = vector.load %arg4[%c0_6, %c0_7] : memref<128x128xbf16, #tpu.memory_space<vmem>>, vector<128x128xbf16>
    %cst_8 = arith.constant dense<0.000000e+00> : vector<8x128xf32>
    %10 = tpu.matmul %8, %9, %cst_8 {dimension_numbers = #tpu.dot_dimension_numbers<[1], [0], [0], [1], [0, 0, 1, 1], [], []>} : vector<8x128xbf16>, vector<128x128xbf16>, vector<8x128xf32> -> vector<8x128xf32>
    %c0_9 = arith.constant 0 : index
    %c0_10 = arith.constant 0 : index
    %11 = vector.load %arg5[%c0_9, %c0_10] : memref<1x128xf32, #tpu.memory_space<vmem>>, vector<1x128xf32>
    %12 = vector.broadcast %11 : vector<1x128xf32> to vector<8x128xf32>
    %13 = arith.addf %10, %12 : vector<8x128xf32>
    %cst_11 = arith.constant 0.000000e+00 : f32
    %14 = vector.broadcast %cst_11 : f32 to vector<8x128xf32>
    %15 = arith.maximumf %13, %14 : vector<8x128xf32>
    %16 = arith.truncf %15 : vector<8x128xf32> to vector<8x128xbf16>
    %c0_12 = arith.constant 0 : index
    %c0_13 = arith.constant 0 : index
    %17 = vector.load %arg6[%c0_12, %c0_13] : memref<128x128xbf16, #tpu.memory_space<vmem>>, vector<128x128xbf16>
    %cst_14 = arith.constant dense<0.000000e+00> : vector<8x128xf32>
    %18 = tpu.matmul %16, %17, %cst_14 {dimension_numbers = #tpu.dot_dimension_numbers<[1], [0], [0], [1], [0, 0, 1, 1], [], []>} : vector<8x128xbf16>, vector<128x128xbf16>, vector<8x128xf32> -> vector<8x128xf32>
    %c0_15 = arith.constant 0 : index
    %c0_16 = arith.constant 0 : index
    %19 = vector.load %arg7[%c0_15, %c0_16] : memref<1x128xf32, #tpu.memory_space<vmem>>, vector<1x128xf32>
    %20 = vector.broadcast %19 : vector<1x128xf32> to vector<8x128xf32>
    %21 = arith.addf %18, %20 : vector<8x128xf32>
    %cst_17 = arith.constant 0.000000e+00 : f32
    %22 = vector.broadcast %cst_17 : f32 to vector<8x128xf32>
    %23 = arith.maximumf %21, %22 : vector<8x128xf32>
    %24 = arith.truncf %23 : vector<8x128xf32> to vector<8x128xbf16>
    %c0_18 = arith.constant 0 : index
    %c0_19 = arith.constant 0 : index
    %25 = vector.load %arg8[%c0_18, %c0_19] : memref<128x128xbf16, #tpu.memory_space<vmem>>, vector<128x128xbf16>
    %cst_20 = arith.constant dense<0.000000e+00> : vector<8x128xf32>
    %26 = tpu.matmul %24, %25, %cst_20 {dimension_numbers = #tpu.dot_dimension_numbers<[1], [0], [0], [1], [0, 0, 1, 1], [], []>} : vector<8x128xbf16>, vector<128x128xbf16>, vector<8x128xf32> -> vector<8x128xf32>
    %c0_21 = arith.constant 0 : index
    %c0_22 = arith.constant 0 : index
    %27 = vector.load %arg9[%c0_21, %c0_22] : memref<1x128xf32, #tpu.memory_space<vmem>>, vector<1x128xf32>
    %28 = vector.broadcast %27 : vector<1x128xf32> to vector<8x128xf32>
    %29 = arith.addf %26, %28 : vector<8x128xf32>
    %cst_23 = arith.constant 0.000000e+00 : f32
    %30 = vector.broadcast %cst_23 : f32 to vector<8x128xf32>
    %31 = arith.maximumf %29, %30 : vector<8x128xf32>
    %32 = arith.truncf %31 : vector<8x128xf32> to vector<8x128xbf16>
    %c0_24 = arith.constant 0 : index
    %c0_25 = arith.constant 0 : index
    %33 = vector.load %arg10[%c0_24, %c0_25] : memref<128x128xbf16, #tpu.memory_space<vmem>>, vector<128x128xbf16>
    %cst_26 = arith.constant dense<0.000000e+00> : vector<8x128xf32>
    %34 = tpu.matmul %32, %33, %cst_26 {dimension_numbers = #tpu.dot_dimension_numbers<[1], [0], [0], [1], [0, 0, 1, 1], [], []>} : vector<8x128xbf16>, vector<128x128xbf16>, vector<8x128xf32> -> vector<8x128xf32>
    %c0_27 = arith.constant 0 : index
    %c0_28 = arith.constant 0 : index
    %35 = vector.load %arg11[%c0_27, %c0_28] : memref<1x128xf32, #tpu.memory_space<vmem>>, vector<1x128xf32>
    %36 = vector.broadcast %35 : vector<1x128xf32> to vector<8x128xf32>
    %37 = arith.addf %34, %36 : vector<8x128xf32>
    %c0_29 = arith.constant 0 : index
    %c0_30 = arith.constant 0 : index
    %38 = vector.load %arg12[%c0_29, %c0_30] : memref<8x128xf32, #tpu.memory_space<vmem>>, vector<8x128xf32>
    tpu.vector_store %arg12[%c0_29, %c0_30], %37 {strides = array<i32>} : memref<8x128xf32, #tpu.memory_space<vmem>>, vector<8x128xf32>,
    return
  }
  func.func @transform_0(%arg0: i32) -> (i32, i32) {
    %c0_i32 = arith.constant 0 : i32
    %c0_i32_0 = arith.constant 0 : i32
    return %arg0, %c0_i32 : i32, i32
  }
  func.func @transform_1(%arg0: i32) -> (i32, i32) {
    %c0_i32 = arith.constant 0 : i32
    %c0_i32_0 = arith.constant 0 : i32
    %c0_i32_1 = arith.constant 0 : i32
    return %c0_i32, %c0_i32_0 : i32, i32
  }
  func.func @transform_2(%arg0: i32) -> (i32, i32) {
    %c0_i32 = arith.constant 0 : i32
    %c0_i32_0 = arith.constant 0 : i32
    %c0_i32_1 = arith.constant 0 : i32
    return %c0_i32, %c0_i32_0 : i32, i32
  }
  func.func @transform_3(%arg0: i32) -> (i32, i32) {
    %c0_i32 = arith.constant 0 : i32
    %c0_i32_0 = arith.constant 0 : i32
    %c0_i32_1 = arith.constant 0 : i32
    return %c0_i32, %c0_i32_0 : i32, i32
  }
  func.func @transform_4(%arg0: i32) -> (i32, i32) {
    %c0_i32 = arith.constant 0 : i32
    %c0_i32_0 = arith.constant 0 : i32
    %c0_i32_1 = arith.constant 0 : i32
    return %c0_i32, %c0_i32_0 : i32, i32
  }
  func.func @transform_5(%arg0: i32) -> (i32, i32) {
    %c0_i32 = arith.constant 0 : i32
    %c0_i32_0 = arith.constant 0 : i32
    %c0_i32_1 = arith.constant 0 : i32
    return %c0_i32, %c0_i32_0 : i32, i32
  }
  func.func @transform_6(%arg0: i32) -> (i32, i32) {
    %c0_i32 = arith.constant 0 : i32
    %c0_i32_0 = arith.constant 0 : i32
    %c0_i32_1 = arith.constant 0 : i32
    return %c0_i32, %c0_i32_0 : i32, i32
  }
  func.func @transform_7(%arg0: i32) -> (i32, i32) {
    %c0_i32 = arith.constant 0 : i32
    %c0_i32_0 = arith.constant 0 : i32
    %c0_i32_1 = arith.constant 0 : i32
    return %c0_i32, %c0_i32_0 : i32, i32
  }
  func.func @transform_8(%arg0: i32) -> (i32, i32) {
    %c0_i32 = arith.constant 0 : i32
    %c0_i32_0 = arith.constant 0 : i32
    %c0_i32_1 = arith.constant 0 : i32
    return %c0_i32, %c0_i32_0 : i32, i32
  }
  func.func @transform_9(%arg0: i32) -> (i32, i32) {
    %c0_i32 = arith.constant 0 : i32
    %c0_i32_0 = arith.constant 0 : i32
    %c0_i32_1 = arith.constant 0 : i32
    return %c0_i32, %c0_i32_0 : i32, i32
  }
  func.func @transform_10(%arg0: i32) -> (i32, i32) {
    %c0_i32 = arith.constant 0 : i32
    %c0_i32_0 = arith.constant 0 : i32
    %c0_i32_1 = arith.constant 0 : i32
    return %c0_i32, %c0_i32_0 : i32, i32
  }
  func.func @transform_11(%arg0: i32) -> (i32, i32) {
    %c0_i32 = arith.constant 0 : i32
    %c0_i32_0 = arith.constant 0 : i32
    return %arg0, %c0_i32 : i32, i32
  }
}

module attributes {stable_mosaic.version = 11 : i64} {
  func.func @_mlp_kernel(%arg0: i32, %arg1: memref<8x128xbf16, #tpu.memory_space<vmem>>, %arg2: memref<128x128xbf16, #tpu.memory_space<vmem>>, %arg3: memref<1x128xf32, #tpu.memory_space<vmem>>, %arg4: memref<128x128xbf16, #tpu.memory_space<vmem>>, %arg5: memref<1x128xf32, #tpu.memory_space<vmem>>, %arg6: memref<128x128xbf16, #tpu.memory_space<vmem>>, %arg7: memref<1x128xf32, #tpu.memory_space<vmem>>, %arg8: memref<128x128xbf16, #tpu.memory_space<vmem>>, %arg9: memref<1x128xf32, #tpu.memory_space<vmem>>, %arg10: memref<128x128xbf16, #tpu.memory_space<vmem>>, %arg11: memref<1x128xf32, #tpu.memory_space<vmem>>, %arg12: memref<8x128xf32, #tpu.memory_space<vmem>>) attributes {dimension_semantics = [#tpu.dimension_semantics<parallel>], iteration_bounds = array<i64: 1>, scalar_prefetch = 0 : i64, scratch_operands = 0 : i64, tpu.core_type = #tpu.core_type<tc>, window_params = [{transform_indices = @transform_0, window_bounds = array<i64: 8, 128>}, {pipeline_mode = #tpu.pipeline_mode<synchronous>, transform_indices = @transform_1, window_bounds = array<i64: 128, 128>}, {pipeline_mode = #tpu.pipeline_mode<synchronous>, transform_indices = @transform_2, window_bounds = array<i64: 1, 128>}, {pipeline_mode = #tpu.pipeline_mode<synchronous>, transform_indices = @transform_3, window_bounds = array<i64: 128, 128>}, {pipeline_mode = #tpu.pipeline_mode<synchronous>, transform_indices = @transform_4, window_bounds = array<i64: 1, 128>}, {pipeline_mode = #tpu.pipeline_mode<synchronous>, transform_indices = @transform_5, window_bounds = array<i64: 128, 128>}, {pipeline_mode = #tpu.pipeline_mode<synchronous>, transform_indices = @transform_6, window_bounds = array<i64: 1, 128>}, {pipeline_mode = #tpu.pipeline_mode<synchronous>, transform_indices = @transform_7, window_bounds = array<i64: 128, 128>}, {pipeline_mode = #tpu.pipeline_mode<synchronous>, transform_indices = @transform_8, window_bounds = array<i64: 1, 128>}, {pipeline_mode = #tpu.pipeline_mode<synchronous>, transform_indices = @transform_9, window_bounds = array<i64: 128, 128>}, {pipeline_mode = #tpu.pipeline_mode<synchronous>, transform_indices = @transform_10, window_bounds = array<i64: 1, 128>}, {transform_indices = @transform_11, window_bounds = array<i64: 8, 128>}]} {
    %c0 = arith.constant 0 : index
    %c0_0 = arith.constant 0 : index
    %0 = vector.load %arg1[%c0, %c0_0] : memref<8x128xbf16, #tpu.memory_space<vmem>>, vector<8x128xbf16>
    %c0_1 = arith.constant 0 : index
    %c0_2 = arith.constant 0 : index
    %1 = vector.load %arg2[%c0_1, %c0_2] : memref<128x128xbf16, #tpu.memory_space<vmem>>, vector<128x128xbf16>
    %cst = arith.constant dense<0.000000e+00> : vector<8x128xf32>
    %2 = tpu.matmul %0, %1, %cst {dimension_numbers = #tpu.dot_dimension_numbers<[1], [0], [0], [1], [0, 0, 1, 1], [], []>} : vector<8x128xbf16>, vector<128x128xbf16>, vector<8x128xf32> -> vector<8x128xf32>
    %c0_3 = arith.constant 0 : index
    %c0_4 = arith.constant 0 : index
    %3 = vector.load %arg3[%c0_3, %c0_4] : memref<1x128xf32, #tpu.memory_space<vmem>>, vector<1x128xf32>
    %4 = vector.broadcast %3 : vector<1x128xf32> to vector<8x128xf32>
    %5 = arith.addf %2, %4 : vector<8x128xf32>
    %cst_5 = arith.constant 0.000000e+00 : f32
    %6 = vector.broadcast %cst_5 : f32 to vector<8x128xf32>
    %7 = arith.maximumf %5, %6 : vector<8x128xf32>
    %8 = arith.truncf %7 : vector<8x128xf32> to vector<8x128xbf16>
    %c0_6 = arith.constant 0 : index
    %c0_7 = arith.constant 0 : index
    %9 = vector.load %arg4[%c0_6, %c0_7] : memref<128x128xbf16, #tpu.memory_space<vmem>>, vector<128x128xbf16>
    %cst_8 = arith.constant dense<0.000000e+00> : vector<8x128xf32>
    %10 = tpu.matmul %8, %9, %cst_8 {dimension_numbers = #tpu.dot_dimension_numbers<[1], [0], [0], [1], [0, 0, 1, 1], [], []>} : vector<8x128xbf16>, vector<128x128xbf16>, vector<8x128xf32> -> vector<8x128xf32>
    %c0_9 = arith.constant 0 : index
    %c0_10 = arith.constant 0 : index
    %11 = vector.load %arg5[%c0_9, %c0_10] : memref<1x128xf32, #tpu.memory_space<vmem>>, vector<1x128xf32>
    %12 = vector.broadcast %11 : vector<1x128xf32> to vector<8x128xf32>
    %13 = arith.addf %10, %12 : vector<8x128xf32>
    %cst_11 = arith.constant 0.000000e+00 : f32
    %14 = vector.broadcast %cst_11 : f32 to vector<8x128xf32>
    %15 = arith.maximumf %13, %14 : vector<8x128xf32>
    %16 = arith.truncf %15 : vector<8x128xf32> to vector<8x128xbf16>
    %c0_12 = arith.constant 0 : index
    %c0_13 = arith.constant 0 : index
    %17 = vector.load %arg6[%c0_12, %c0_13] : memref<128x128xbf16, #tpu.memory_space<vmem>>, vector<128x128xbf16>
    %cst_14 = arith.constant dense<0.000000e+00> : vector<8x128xf32>
    %18 = tpu.matmul %16, %17, %cst_14 {dimension_numbers = #tpu.dot_dimension_numbers<[1], [0], [0], [1], [0, 0, 1, 1], [], []>} : vector<8x128xbf16>, vector<128x128xbf16>, vector<8x128xf32> -> vector<8x128xf32>
    %c0_15 = arith.constant 0 : index
    %c0_16 = arith.constant 0 : index
    %19 = vector.load %arg7[%c0_15, %c0_16] : memref<1x128xf32, #tpu.memory_space<vmem>>, vector<1x128xf32>
    %20 = vector.broadcast %19 : vector<1x128xf32> to vector<8x128xf32>
    %21 = arith.addf %18, %20 : vector<8x128xf32>
    %cst_17 = arith.constant 0.000000e+00 : f32
    %22 = vector.broadcast %cst_17 : f32 to vector<8x128xf32>
    %23 = arith.maximumf %21, %22 : vector<8x128xf32>
    %24 = arith.truncf %23 : vector<8x128xf32> to vector<8x128xbf16>
    %c0_18 = arith.constant 0 : index
    %c0_19 = arith.constant 0 : index
    %25 = vector.load %arg8[%c0_18, %c0_19] : memref<128x128xbf16, #tpu.memory_space<vmem>>, vector<128x128xbf16>
    %cst_20 = arith.constant dense<0.000000e+00> : vector<8x128xf32>
    %26 = tpu.matmul %24, %25, %cst_20 {dimension_numbers = #tpu.dot_dimension_numbers<[1], [0], [0], [1], [0, 0, 1, 1], [], []>} : vector<8x128xbf16>, vector<128x128xbf16>, vector<8x128xf32> -> vector<8x128xf32>
    %c0_21 = arith.constant 0 : index
    %c0_22 = arith.constant 0 : index
    %27 = vector.load %arg9[%c0_21, %c0_22] : memref<1x128xf32, #tpu.memory_space<vmem>>, vector<1x128xf32>
    %28 = vector.broadcast %27 : vector<1x128xf32> to vector<8x128xf32>
    %29 = arith.addf %26, %28 : vector<8x128xf32>
    %cst_23 = arith.constant 0.000000e+00 : f32
    %30 = vector.broadcast %cst_23 : f32 to vector<8x128xf32>
    %31 = arith.maximumf %29, %30 : vector<8x128xf32>
    %32 = arith.truncf %31 : vector<8x128xf32> to vector<8x128xbf16>
    %c0_24 = arith.constant 0 : index
    %c0_25 = arith.constant 0 : index
    %33 = vector.load %arg10[%c0_24, %c0_25] : memref<128x128xbf16, #tpu.memory_space<vmem>>, vector<128x128xbf16>
    %cst_26 = arith.constant dense<0.000000e+00> : vector<8x128xf32>
    %34 = tpu.matmul %32, %33, %cst_26 {dimension_numbers = #tpu.dot_dimension_numbers<[1], [0], [0], [1], [0, 0, 1, 1], [], []>} : vector<8x128xbf16>, vector<128x128xbf16>, vector<8x128xf32> -> vector<8x128xf32>
    %c0_27 = arith.constant 0 : index
    %c0_28 = arith.constant 0 : index
    %35 = vector.load %arg11[%c0_27, %c0_28] : memref<1x128xf32, #tpu.memory_space<vmem>>, vector<1x128xf32>
    %36 = vector.broadcast %35 : vector<1x128xf32> to vector<8x128xf32>
    %37 = arith.addf %34, %36 : vector<8x128xf32>
    %c0_29 = arith.constant 0 : index
    %c0_30 = arith.constant 0 : index
    %38 = vector.load %arg12[%c0_29, %c0_30] : memref<8x128xf32, #tpu.memory_space<vmem>>, vector<8x128xf32>
    tpu.vector_store %arg12[%c0_29, %c0_30], %37 {strides = array<i32>} : memref<8x128xf32, #tpu.memory_space<vmem>>, vector<8x128xf32>,
    return
  }
  func.func @transform_0(%arg0: i32) -> (i32, i32) {
    %c0_i32 = arith.constant 0 : i32
    %c0_i32_0 = arith.constant 0 : i32
    return %arg0, %c0_i32 : i32, i32
  }
  func.func @transform_1(%arg0: i32) -> (i32, i32) {
    %c0_i32 = arith.constant 0 : i32
    %c0_i32_0 = arith.constant 0 : i32
    %c0_i32_1 = arith.constant 0 : i32
    return %c0_i32, %c0_i32_0 : i32, i32
  }
  func.func @transform_2(%arg0: i32) -> (i32, i32) {
    %c0_i32 = arith.constant 0 : i32
    %c0_i32_0 = arith.constant 0 : i32
    %c0_i32_1 = arith.constant 0 : i32
    return %c0_i32, %c0_i32_0 : i32, i32
  }
  func.func @transform_3(%arg0: i32) -> (i32, i32) {
    %c0_i32 = arith.constant 0 : i32
    %c0_i32_0 = arith.constant 0 : i32
    %c0_i32_1 = arith.constant 0 : i32
    return %c0_i32, %c0_i32_0 : i32, i32
  }
  func.func @transform_4(%arg0: i32) -> (i32, i32) {
    %c0_i32 = arith.constant 0 : i32
    %c0_i32_0 = arith.constant 0 : i32
    %c0_i32_1 = arith.constant 0 : i32
    return %c0_i32, %c0_i32_0 : i32, i32
  }
  func.func @transform_5(%arg0: i32) -> (i32, i32) {
    %c0_i32 = arith.constant 0 : i32
    %c0_i32_0 = arith.constant 0 : i32
    %c0_i32_1 = arith.constant 0 : i32
    return %c0_i32, %c0_i32_0 : i32, i32
  }
  func.func @transform_6(%arg0: i32) -> (i32, i32) {
    %c0_i32 = arith.constant 0 : i32
    %c0_i32_0 = arith.constant 0 : i32
    %c0_i32_1 = arith.constant 0 : i32
    return %c0_i32, %c0_i32_0 : i32, i32
  }
  func.func @transform_7(%arg0: i32) -> (i32, i32) {
    %c0_i32 = arith.constant 0 : i32
    %c0_i32_0 = arith.constant 0 : i32
    %c0_i32_1 = arith.constant 0 : i32
    return %c0_i32, %c0_i32_0 : i32, i32
  }
  func.func @transform_8(%arg0: i32) -> (i32, i32) {
    %c0_i32 = arith.constant 0 : i32
    %c0_i32_0 = arith.constant 0 : i32
    %c0_i32_1 = arith.constant 0 : i32
    return %c0_i32, %c0_i32_0 : i32, i32
  }
  func.func @transform_9(%arg0: i32) -> (i32, i32) {
    %c0_i32 = arith.constant 0 : i32
    %c0_i32_0 = arith.constant 0 : i32
    %c0_i32_1 = arith.constant 0 : i32
    return %c0_i32, %c0_i32_0 : i32, i32
  }
  func.func @transform_10(%arg0: i32) -> (i32, i32) {
    %c0_i32 = arith.constant 0 : i32
    %c0_i32_0 = arith.constant 0 : i32
    %c0_i32_1 = arith.constant 0 : i32
    return %c0_i32, %c0_i32_0 : i32, i32
  }
  func.func @transform_11(%arg0: i32) -> (i32, i32) {
    %c0_i32 = arith.constant 0 : i32
    %c0_i32_0 = arith.constant 0 : i32
    return %arg0, %c0_i32 : i32, i32
  }
}

</mosaic_0001>

<bundles_post_ra>
// kernel: tpu_custom_call.1
= control target key start
LH: loop header
LB: loop body
LE: loop exit
PB: predicated region body
PF: predicated region fallthrough
CT: control target
= control target key end

     0   :  { %16 = vsyncpa [#allocation3], 0  ;;  %s1078_s0 = inlined_call_operand.hbm [shape: bf16[8,128], index: 0, kind: input, shape index: {}]   ;;  %s1079_s1 = inlined_call_operand.hbm [shape: bf16[128,128], index: 1, kind: input, shape index: {}]   ;;  %s1080_s2 = inlined_call_operand.vmem [shape: f32[1,128], index: 2, kind: input, shape index: {}]   ;;  %s1081_s3 = inlined_call_operand.hbm [shape: bf16[128,128], index: 3, kind: input, shape index: {}]   ;;  %s1082_s4 = inlined_call_operand.vmem [shape: f32[1,128], index: 4, kind: input, shape index: {}]   ;;  %s1083_s5 = inlined_call_operand.hbm [shape: bf16[128,128], index: 5, kind: input, shape index: {}]   ;;  %s1084_s6 = inlined_call_operand.vmem [shape: f32[1,128], index: 6, kind: input, shape index: {}]   ;;  %s1085_s7 = inlined_call_operand.hbm [shape: bf16[128,128], index: 7, kind: input, shape index: {}]   ;;  %s1086_s8 = inlined_call_operand.vmem [shape: f32[1,128], index: 8, kind: input, shape index: {}]   ;;  %s1087_s9 = inlined_call_operand.hbm [shape: bf16[128,128], index: 9, kind: input, shape index: {}]   ;;  %s1088_s10 = inlined_call_operand.vmem [shape: f32[1,128], index: 10, kind: input, shape index: {}]   ;;  %s1089_s11 = inlined_call_operand.hbm [shape: f32[8,128], index: 11, kind: output, shape index: {}]  }
   0x1   :  { %17 = vsyncpa [#allocation6], 0 }
   0x2   :  { %18 = vsyncpa [#allocation9], 0 }
   0x3   :  { %19 = vsyncpa [#allocation12], 0  ;;  %s36_s19 = sshll.u32 %s1079_s1, 4  ;;  %s37_s19 = int_to_ptr.hbm [resolvable:$true] %s36_s19 }
   0x4   :  { %20 = vsyncpa [#allocation4], 0  ;;  %s958_s20 = smov [#allocation5]   ;;  %s66_s24 = sshll.u32 %s1083_s5, 4  ;;  %s67_s24 = int_to_ptr.hbm [resolvable:$true] %s66_s24 }
   0x5   :  { %s38_s21 = sshll.u32 %s958_s20, 4  ;;  %s959_s25 = smov 64   ;;  %s39_s21 = int_to_ptr.vmem [resolvable:$true] %s38_s21 }
   0x6   :  { %s960_s26 = smov 4   ;;  %s961_s27 = smov [#allocation8]  }
   0x7   :  { %44 = dma.hbm_to_vmem [thread:$0]  %s37_s19, 1024, %s39_s21, [#allocation6], %s959_s25, %s959_s25, %s960_s26  }
   0x8   :  { %s68_s28 = sshll.u32 %s961_s27, 4  ;;  %s26_s30 = sshll.u32 %s1078_s0, 4  ;;  %s69_s28 = int_to_ptr.vmem [resolvable:$true] %s68_s28  ;;  %s27_s30 = int_to_ptr.hbm [resolvable:$true] %s26_s30 }
   0x9   :  { %74 = dma.hbm_to_vmem [thread:$0]  %s67_s24, 1024, %s69_s28, [#allocation9], %s959_s25, %s959_s25, %s960_s26  }
   0xa   :  { %s51_s13 = sshll.u32 %s1081_s3, 4  ;;  %s962_s14 = smov [#allocation2]   ;;  %s52_s13 = int_to_ptr.hbm [resolvable:$true] %s51_s13 }
   0xb   :  { %s28_s15 = sshll.u32 %s962_s14, 4  ;;  %s963_s16 = smov [#allocation7]   ;;  %s29_s15 = int_to_ptr.vmem [resolvable:$true] %s28_s15 }
   0xc   :  { %31 = dma.hbm_to_vmem [thread:$0]  %s27_s30, 64, %s29_s15, [#allocation3]  }
   0xd   :  { %s53_s17 = sshll.u32 %s963_s16, 4  ;;  %s81_s0 = sshll.u32 %s1085_s7, 4  ;;  %s54_s17 = int_to_ptr.vmem [resolvable:$true] %s53_s17  ;;  %s82_s0 = int_to_ptr.hbm [resolvable:$true] %s81_s0 }
   0xe   :  { %59 = dma.hbm_to_vmem [thread:$0]  %s52_s13, 1024, %s54_s17, [#allocation6], %s959_s25, %s959_s25, %s960_s26  }
   0xf   :  { %s96_s3 = sshll.u32 %s1087_s9, 4  ;;  %s964_s22 = smov [#allocation10]   ;;  %s97_s3 = int_to_ptr.hbm [resolvable:$true] %s96_s3 }
  0x10   :  { %s83_s23 = sshll.u32 %s964_s22, 4  ;;  %s965_s24 = smov [#allocation11]   ;;  %s84_s23 = int_to_ptr.vmem [resolvable:$true] %s83_s23 }
  0x11   :  { %89 = dma.hbm_to_vmem [thread:$0]  %s82_s0, 1024, %s84_s23, [#allocation9], %s959_s25, %s959_s25, %s960_s26  }
  0x12   :  { %s98_s7 = sshll.u32 %s965_s24, 4  ;;  %s99_s7 = int_to_ptr.vmem [resolvable:$true] %s98_s7 }
  0x13   :  { %104 = dma.hbm_to_vmem [thread:$0]  %s97_s3, 1024, %s99_s7, [#allocation12], %s959_s25, %s959_s25, %s960_s26  }
  0x14   :  { %948 = dma.done.wait [#allocation3], 64  }
  0x15   :  { %949 = vsyncadd [#allocation3], 4294967232 }
  0x16   :  { %950 = dma.done.wait [#allocation6], 2048  }
  0x17   :  { %951 = vsyncadd [#allocation6], 4294965248 }
  0x18   :  { %952 = dma.done.wait [#allocation9], 2048  }
  0x19   :  { %953 = vsyncadd [#allocation9], 4294965248 }
  0x1a   :  { %954 = dma.done.wait [#allocation12], 1024  }
  0x1b   :  { %955 = vsyncadd [#allocation12], 4294966272  ;;  %v733_v0 = vld [vmem:[#allocation5 + $0x38] sm:$0xff]  ;;  %v732_v1 = vld [vmem:[#allocation5 + $0x30] sm:$0xff]  ;;  %s966_s30 = smov [#allocation13]   ;;  %s553_s14 = sshll.u32 %s1089_s11, 4  ;;  %s554_s14 = int_to_ptr.hbm [resolvable:$true] %s553_s14 }
  0x1c   :  { %200 = vmatpush.bf16.msra.mxu0 %v733_v0  ;;  %v741_v2 = vld [vmem:[#allocation7 + $0x38] sm:$0xff]  ;;  %v731_v3 = vld [vmem:[#allocation5 + $0x28] sm:$0xff]  ;;  %v740_v4 = vld [vmem:[#allocation7 + $0x30] sm:$0xff]  ;;  %s551_s5 = sshll.u32 %s966_s30, 4  ;;  %s552_s5 = int_to_ptr.vmem [resolvable:$true] %s551_s5 }
  0x1d   :  { %283 = vmatpush.bf16.msra.mxu1 %v741_v2  ;;  %v739_v5 = vld [vmem:[#allocation7 + $0x28] sm:$0xff]  ;;  %v730_v6 = vld [vmem:[#allocation5 + $0x20] sm:$0xff]  ;;  %v729_v8 = vld [vmem:[#allocation5 + $0x18] sm:$0xff] }
  0x1e   :  { %v738_v7 = vld [vmem:[#allocation7 + $0x20] sm:$0xff]  ;;  %v737_v9 = vld [vmem:[#allocation7 + $0x18] sm:$0xff]  ;;  %v728_v10 = vld [vmem:[#allocation5 + $0x10] sm:$0xff] }
  0x1f   :  { %v736_v11 = vld [vmem:[#allocation7 + $0x10] sm:$0xff]  ;;  %v727_v12 = vld [vmem:[#allocation5 + $0x8] sm:$0xff]  ;;  %v726_v13 = vld [vmem:[#allocation5] sm:$0xff] }
  0x20   :  { %201 = vmatpush.bf16.msra.mxu0 %v732_v1  ;;  %v131_v14 = vld [vmem:[#allocation2] sm:$0xf]  ;;  %v735_v15 = vld [vmem:[#allocation7 + $0x8] sm:$0xff]  ;;  %v734_v16 = vld [vmem:[#allocation7] sm:$0xff] }
  0x21   :  { %284 = vmatpush.bf16.msra.mxu1 %v740_v4  ;;  %v749_v17 = vld [vmem:[#allocation8 + $0x38] sm:$0xff]  ;;  %v748_v18 = vld [vmem:[#allocation8 + $0x30] sm:$0xff]  ;;  %v747_v19 = vld [vmem:[#allocation8 + $0x28] sm:$0xff] }
  0x22   :  { %366 = vmatpush.bf16.msra.mxu2 %v749_v17  ;;  %v746_v20 = vld [vmem:[#allocation8 + $0x20] sm:$0xff]  ;;  %v745_v21 = vld [vmem:[#allocation8 + $0x18] sm:$0xff]  ;;  %v744_v22 = vld [vmem:[#allocation8 + $0x10] sm:$0xff] }
  0x23   :  { %v775_v23 = vld [vmem:[%s1080_s2] ss:$0 sm:$0xff]  ;;  %v743_v29 = vld [vmem:[#allocation8 + $0x8] sm:$0xff]  ;;  %v742_v30 = vld [vmem:[#allocation8] sm:$0xff] }
  0x24   :  { %202 = vmatpush.bf16.msra.mxu0 %v731_v3  ;;  %v757_v31 = vld [vmem:[#allocation10 + $0x38] sm:$0xff]  ;;  %v756_v32 = vld [vmem:[#allocation10 + $0x30] sm:$0xff]  ;;  %v755_v33 = vld [vmem:[#allocation10 + $0x28] sm:$0xff] }
  0x25   :  { %285 = vmatpush.bf16.msra.mxu1 %v739_v5  ;;  %449 = vmatpush.bf16.msra.mxu3 %v757_v31  ;;  %v754_v34 = vld [vmem:[#allocation10 + $0x20] sm:$0xff]  ;;  %v753_v35 = vld [vmem:[#allocation10 + $0x18] sm:$0xff]  ;;  %v752_v36 = vld [vmem:[#allocation10 + $0x10] sm:$0xff] }
  0x26   :  { %367 = vmatpush.bf16.msra.mxu2 %v748_v18  ;;  %v776_v37 = vld [vmem:[%s1082_s4] ss:$0 sm:$0xff]  ;;  %v751_v43 = vld [vmem:[#allocation10 + $0x8] sm:$0xff]  ;;  %v750_v44 = vld [vmem:[#allocation10] sm:$0xff] }
  0x27   :  { %v765_v45 = vld [vmem:[#allocation11 + $0x38] sm:$0xff]  ;;  %v764_v46 = vld [vmem:[#allocation11 + $0x30] sm:$0xff]  ;;  %v763_v47 = vld [vmem:[#allocation11 + $0x28] sm:$0xff] }
  0x28   :  { %203 = vmatpush.bf16.msra.mxu0 %v730_v6  ;;  %v762_v48 = vld [vmem:[#allocation11 + $0x20] sm:$0xff]  ;;  %v761_v49 = vld [vmem:[#allocation11 + $0x18] sm:$0xff]  ;;  %v760_v50 = vld [vmem:[#allocation11 + $0x10] sm:$0xff] }
  0x29   :  { %286 = vmatpush.bf16.msra.mxu1 %v738_v7  ;;  %450 = vmatpush.bf16.msra.mxu3 %v756_v32  ;;  %v777_v51 = vld [vmem:[%s1084_s6] ss:$0 sm:$0xff]  ;;  %v759_v57 = vld [vmem:[#allocation11 + $0x8] sm:$0xff]  ;;  %v758_v58 = vld [vmem:[#allocation11] sm:$0xff] }
  0x2a   :  { %368 = vmatpush.bf16.msra.mxu2 %v747_v19  ;;  %v778_v59 = vld [vmem:[%s1086_s8] ss:$0 sm:$0xff] }
  0x2b   :  { %v779_v1 = vld [vmem:[%s1088_s10] ss:$0 sm:$0xff] }
  0x2c   :  { %204 = vmatpush.bf16.msra.mxu0 %v729_v8 }
  0x2d   :  { %287 = vmatpush.bf16.msra.mxu1 %v737_v9  ;;  %451 = vmatpush.bf16.msra.mxu3 %v755_v33 }
  0x2e   :  { %369 = vmatpush.bf16.msra.mxu2 %v746_v20 }
  0x30   :  { %205 = vmatpush.bf16.msra.mxu0 %v728_v10 }
  0x31   :  { %288 = vmatpush.bf16.msra.mxu1 %v736_v11  ;;  %452 = vmatpush.bf16.msra.mxu3 %v754_v34 }
  0x32   :  { %370 = vmatpush.bf16.msra.mxu2 %v745_v21 }
  0x34   :  { %206 = vmatpush.bf16.msra.mxu0 %v727_v12 }
  0x35   :  { %289 = vmatpush.bf16.msra.mxu1 %v735_v15  ;;  %453 = vmatpush.bf16.msra.mxu3 %v753_v35 }
  0x36   :  { %371 = vmatpush.bf16.msra.mxu2 %v744_v22 }
  0x38   :  { %207 = vmatpush.bf16.msra.mxu0 %v726_v13 }
  0x39   :  { %290 = vmatpush.bf16.msra.mxu1 %v734_v16  ;;  %454 = vmatpush.bf16.msra.mxu3 %v752_v36 }
  0x3a   :  { %372 = vmatpush.bf16.msra.mxu2 %v743_v29 }
  0x3b   :  { %208 = vmatmul.bf16.vlgmr.msra.gmra.mxu0 %v131_v14 }
  0x3c   :  { %532 = vmatpush.bf16.msrb.mxu0 %v765_v45 }
  0x3d   :  { %455 = vmatpush.bf16.msra.mxu3 %v751_v43 }
  0x3e   :  { %373 = vmatpush.bf16.msra.mxu2 %v742_v30 }
  0x40   :  { %533 = vmatpush.bf16.msrb.mxu0 %v764_v46 }
  0x41   :  { %456 = vmatpush.bf16.msra.mxu3 %v750_v44 }
  0x44   :  { %534 = vmatpush.bf16.msrb.mxu0 %v763_v47 }
  0x48   :  { %535 = vmatpush.bf16.msrb.mxu0 %v762_v48 }
  0x4c   :  { %536 = vmatpush.bf16.msrb.mxu0 %v761_v49 }
  0x50   :  { %537 = vmatpush.bf16.msrb.mxu0 %v760_v50 }
  0x54   :  { %538 = vmatpush.bf16.msrb.mxu0 %v759_v57 }
  0x58   :  { %539 = vmatpush.bf16.msrb.mxu0 %v758_v58 }
  0xb8   :  { %v209_v24 = vpop.f32.mrf.mxu0 }
  0xb9   :  { %v210_v25 = vadd.f32 %v775_v23, %v209_v24 }
  0xbb   :  { %v213_v26 = vmax.f32 %v210_v25, 0.0 }
  0xbd   :  { %v214_v27 = vpack.c.bf16 %v213_v26, %v213_v26 }
  0xbf   :  { %291 = vmatmul.bf16.vlgmr.msra.gmra.mxu1 %v214_v27 }
  0xc0   :  { %v211_v28 = vpop.f32.mrf.mxu0 }
 0x13c   :  { %v292_v38 = vpop.f32.mrf.mxu1 }
 0x13d   :  { %v293_v39 = vadd.f32 %v776_v37, %v292_v38 }
 0x13f   :  { %v296_v40 = vmax.f32 %v293_v39, 0.0 }
 0x141   :  { %v297_v41 = vpack.c.bf16 %v296_v40, %v296_v40 }
 0x143   :  { %374 = vmatmul.bf16.vlgmr.msra.gmra.mxu2 %v297_v41 }
 0x144   :  { %v294_v42 = vpop.f32.mrf.mxu1 }
 0x1c6   :  { %v375_v52 = vpop.f32.mrf.mxu2 }
 0x1c7   :  { %v376_v53 = vadd.f32 %v777_v51, %v375_v52 }
 0x1c9   :  { %v379_v54 = vmax.f32 %v376_v53, 0.0 }
 0x1cb   :  { %v380_v55 = vpack.c.bf16 %v379_v54, %v379_v54 }
 0x1cd   :  { %457 = vmatmul.bf16.vlgmr.msra.gmra.mxu3 %v380_v55 }
 0x1ce   :  { %v377_v56 = vpop.f32.mrf.mxu2 }
 0x250   :  { %v458_v60 = vpop.f32.mrf.mxu3 }
 0x251   :  { %v459_v61 = vadd.f32 %v778_v59, %v458_v60 }
 0x253   :  { %v462_v62 = vmax.f32 %v459_v61, 0.0 }
 0x255   :  { %v463_v63 = vpack.c.bf16 %v462_v62, %v462_v62 }
 0x257   :  { %540 = vmatmul.bf16.vlgmr.msrb.gmra.mxu0 %v463_v63 }
 0x258   :  { %v460_v0 = vpop.f32.mrf.mxu3 }
 0x2d4   :  { %v541_v2 = vpop.f32.mrf.mxu0 }
 0x2d5   :  { %v542_v3 = vadd.f32 %v779_v1, %v541_v2 }
 0x2d7   :  { %545 = vst [vmem:[#allocation13] sm:$0xff] %v542_v3 }
 0x2d8   :  { %556 = dma.vmem_to_hbm [thread:$0]  %s552_s5, 128, %s554_s14, [#allocation4]  }
 0x2dc   :  { %v543_v4 = vpop.f32.mrf.mxu0 }
 0x2dd   :  { %956 = dma.done.wait [#allocation4], 128  }
 0x2de   :  { %957 = vsyncadd [#allocation4], 4294967168 }
 0x2df   :  { %561 = vsyncpa [#allocation3], 1 }
 0x2e0   :  { %562 = vsyncpa [#allocation6], 1 }
 0x2e1   :  { %563 = vsyncpa [#allocation9], 1 }
 0x2e2   :  { %564 = vsyncpa [#allocation12], 1 }
 0x2e3   :  { %565 = vsyncpa [#allocation4], 1 }

// kernel: tpu_custom_call.1
= control target key start
LH: loop header
LB: loop body
LE: loop exit
PB: predicated region body
PF: predicated region fallthrough
CT: control target
= control target key end

     0   :  { %16 = vsyncpa [#allocation3], 0  ;;  %s1078_s0 = inlined_call_operand.hbm [shape: bf16[8,128], index: 0, kind: input, shape index: {}]   ;;  %s1079_s1 = inlined_call_operand.hbm [shape: bf16[128,128], index: 1, kind: input, shape index: {}]   ;;  %s1080_s2 = inlined_call_operand.vmem [shape: f32[1,128], index: 2, kind: input, shape index: {}]   ;;  %s1081_s3 = inlined_call_operand.hbm [shape: bf16[128,128], index: 3, kind: input, shape index: {}]   ;;  %s1082_s4 = inlined_call_operand.vmem [shape: f32[1,128], index: 4, kind: input, shape index: {}]   ;;  %s1083_s5 = inlined_call_operand.hbm [shape: bf16[128,128], index: 5, kind: input, shape index: {}]   ;;  %s1084_s6 = inlined_call_operand.vmem [shape: f32[1,128], index: 6, kind: input, shape index: {}]   ;;  %s1085_s7 = inlined_call_operand.hbm [shape: bf16[128,128], index: 7, kind: input, shape index: {}]   ;;  %s1086_s8 = inlined_call_operand.vmem [shape: f32[1,128], index: 8, kind: input, shape index: {}]   ;;  %s1087_s9 = inlined_call_operand.hbm [shape: bf16[128,128], index: 9, kind: input, shape index: {}]   ;;  %s1088_s10 = inlined_call_operand.vmem [shape: f32[1,128], index: 10, kind: input, shape index: {}]   ;;  %s1089_s11 = inlined_call_operand.hbm [shape: f32[8,128], index: 11, kind: output, shape index: {}]  }
   0x1   :  { %17 = vsyncpa [#allocation6], 0 }
   0x2   :  { %18 = vsyncpa [#allocation9], 0 }
   0x3   :  { %19 = vsyncpa [#allocation12], 0  ;;  %s36_s19 = sshll.u32 %s1079_s1, 4  ;;  %s37_s19 = int_to_ptr.hbm [resolvable:$true] %s36_s19 }
   0x4   :  { %20 = vsyncpa [#allocation4], 0  ;;  %s958_s20 = smov [#allocation5]   ;;  %s66_s24 = sshll.u32 %s1083_s5, 4  ;;  %s67_s24 = int_to_ptr.hbm [resolvable:$true] %s66_s24 }
   0x5   :  { %s38_s21 = sshll.u32 %s958_s20, 4  ;;  %s959_s25 = smov 64   ;;  %s39_s21 = int_to_ptr.vmem [resolvable:$true] %s38_s21 }
   0x6   :  { %s960_s26 = smov 4   ;;  %s961_s27 = smov [#allocation8]  }
   0x7   :  { %44 = dma.hbm_to_vmem [thread:$0]  %s37_s19, 1024, %s39_s21, [#allocation6], %s959_s25, %s959_s25, %s960_s26  }
   0x8   :  { %s68_s28 = sshll.u32 %s961_s27, 4  ;;  %s26_s30 = sshll.u32 %s1078_s0, 4  ;;  %s69_s28 = int_to_ptr.vmem [resolvable:$true] %s68_s28  ;;  %s27_s30 = int_to_ptr.hbm [resolvable:$true] %s26_s30 }
   0x9   :  { %74 = dma.hbm_to_vmem [thread:$0]  %s67_s24, 1024, %s69_s28, [#allocation9], %s959_s25, %s959_s25, %s960_s26  }
   0xa   :  { %s51_s13 = sshll.u32 %s1081_s3, 4  ;;  %s962_s14 = smov [#allocation2]   ;;  %s52_s13 = int_to_ptr.hbm [resolvable:$true] %s51_s13 }
   0xb   :  { %s28_s15 = sshll.u32 %s962_s14, 4  ;;  %s963_s16 = smov [#allocation7]   ;;  %s29_s15 = int_to_ptr.vmem [resolvable:$true] %s28_s15 }
   0xc   :  { %31 = dma.hbm_to_vmem [thread:$0]  %s27_s30, 64, %s29_s15, [#allocation3]  }
   0xd   :  { %s53_s17 = sshll.u32 %s963_s16, 4  ;;  %s81_s0 = sshll.u32 %s1085_s7, 4  ;;  %s54_s17 = int_to_ptr.vmem [resolvable:$true] %s53_s17  ;;  %s82_s0 = int_to_ptr.hbm [resolvable:$true] %s81_s0 }
   0xe   :  { %59 = dma.hbm_to_vmem [thread:$0]  %s52_s13, 1024, %s54_s17, [#allocation6], %s959_s25, %s959_s25, %s960_s26  }
   0xf   :  { %s96_s3 = sshll.u32 %s1087_s9, 4  ;;  %s964_s22 = smov [#allocation10]   ;;  %s97_s3 = int_to_ptr.hbm [resolvable:$true] %s96_s3 }
  0x10   :  { %s83_s23 = sshll.u32 %s964_s22, 4  ;;  %s965_s24 = smov [#allocation11]   ;;  %s84_s23 = int_to_ptr.vmem [resolvable:$true] %s83_s23 }
  0x11   :  { %89 = dma.hbm_to_vmem [thread:$0]  %s82_s0, 1024, %s84_s23, [#allocation9], %s959_s25, %s959_s25, %s960_s26  }
  0x12   :  { %s98_s7 = sshll.u32 %s965_s24, 4  ;;  %s99_s7 = int_to_ptr.vmem [resolvable:$true] %s98_s7 }
  0x13   :  { %104 = dma.hbm_to_vmem [thread:$0]  %s97_s3, 1024, %s99_s7, [#allocation12], %s959_s25, %s959_s25, %s960_s26  }
  0x14   :  { %948 = dma.done.wait [#allocation3], 64  }
  0x15   :  { %949 = vsyncadd [#allocation3], 4294967232 }
  0x16   :  { %950 = dma.done.wait [#allocation6], 2048  }
  0x17   :  { %951 = vsyncadd [#allocation6], 4294965248 }
  0x18   :  { %952 = dma.done.wait [#allocation9], 2048  }
  0x19   :  { %953 = vsyncadd [#allocation9], 4294965248 }
  0x1a   :  { %954 = dma.done.wait [#allocation12], 1024  }
  0x1b   :  { %955 = vsyncadd [#allocation12], 4294966272  ;;  %v733_v0 = vld [vmem:[#allocation5 + $0x38] sm:$0xff]  ;;  %v732_v1 = vld [vmem:[#allocation5 + $0x30] sm:$0xff]  ;;  %s966_s30 = smov [#allocation13]   ;;  %s553_s14 = sshll.u32 %s1089_s11, 4  ;;  %s554_s14 = int_to_ptr.hbm [resolvable:$true] %s553_s14 }
  0x1c   :  { %200 = vmatpush.bf16.msra.mxu0 %v733_v0  ;;  %v741_v2 = vld [vmem:[#allocation7 + $0x38] sm:$0xff]  ;;  %v731_v3 = vld [vmem:[#allocation5 + $0x28] sm:$0xff]  ;;  %v740_v4 = vld [vmem:[#allocation7 + $0x30] sm:$0xff]  ;;  %s551_s5 = sshll.u32 %s966_s30, 4  ;;  %s552_s5 = int_to_ptr.vmem [resolvable:$true] %s551_s5 }
  0x1d   :  { %283 = vmatpush.bf16.msra.mxu1 %v741_v2  ;;  %v739_v5 = vld [vmem:[#allocation7 + $0x28] sm:$0xff]  ;;  %v730_v6 = vld [vmem:[#allocation5 + $0x20] sm:$0xff]  ;;  %v729_v8 = vld [vmem:[#allocation5 + $0x18] sm:$0xff] }
  0x1e   :  { %v738_v7 = vld [vmem:[#allocation7 + $0x20] sm:$0xff]  ;;  %v737_v9 = vld [vmem:[#allocation7 + $0x18] sm:$0xff]  ;;  %v728_v10 = vld [vmem:[#allocation5 + $0x10] sm:$0xff] }
  0x1f   :  { %v736_v11 = vld [vmem:[#allocation7 + $0x10] sm:$0xff]  ;;  %v727_v12 = vld [vmem:[#allocation5 + $0x8] sm:$0xff]  ;;  %v726_v13 = vld [vmem:[#allocation5] sm:$0xff] }
  0x20   :  { %201 = vmatpush.bf16.msra.mxu0 %v732_v1  ;;  %v131_v14 = vld [vmem:[#allocation2] sm:$0xf]  ;;  %v735_v15 = vld [vmem:[#allocation7 + $0x8] sm:$0xff]  ;;  %v734_v16 = vld [vmem:[#allocation7] sm:$0xff] }
  0x21   :  { %284 = vmatpush.bf16.msra.mxu1 %v740_v4  ;;  %v749_v17 = vld [vmem:[#allocation8 + $0x38] sm:$0xff]  ;;  %v748_v18 = vld [vmem:[#allocation8 + $0x30] sm:$0xff]  ;;  %v747_v19 = vld [vmem:[#allocation8 + $0x28] sm:$0xff] }
  0x22   :  { %366 = vmatpush.bf16.msra.mxu2 %v749_v17  ;;  %v746_v20 = vld [vmem:[#allocation8 + $0x20] sm:$0xff]  ;;  %v745_v21 = vld [vmem:[#allocation8 + $0x18] sm:$0xff]  ;;  %v744_v22 = vld [vmem:[#allocation8 + $0x10] sm:$0xff] }
  0x23   :  { %v775_v23 = vld [vmem:[%s1080_s2] ss:$0 sm:$0xff]  ;;  %v743_v29 = vld [vmem:[#allocation8 + $0x8] sm:$0xff]  ;;  %v742_v30 = vld [vmem:[#allocation8] sm:$0xff] }
  0x24   :  { %202 = vmatpush.bf16.msra.mxu0 %v731_v3  ;;  %v757_v31 = vld [vmem:[#allocation10 + $0x38] sm:$0xff]  ;;  %v756_v32 = vld [vmem:[#allocation10 + $0x30] sm:$0xff]  ;;  %v755_v33 = vld [vmem:[#allocation10 + $0x28] sm:$0xff] }
  0x25   :  { %285 = vmatpush.bf16.msra.mxu1 %v739_v5  ;;  %449 = vmatpush.bf16.msra.mxu3 %v757_v31  ;;  %v754_v34 = vld [vmem:[#allocation10 + $0x20] sm:$0xff]  ;;  %v753_v35 = vld [vmem:[#allocation10 + $0x18] sm:$0xff]  ;;  %v752_v36 = vld [vmem:[#allocation10 + $0x10] sm:$0xff] }
  0x26   :  { %367 = vmatpush.bf16.msra.mxu2 %v748_v18  ;;  %v776_v37 = vld [vmem:[%s1082_s4] ss:$0 sm:$0xff]  ;;  %v751_v43 = vld [vmem:[#allocation10 + $0x8] sm:$0xff]  ;;  %v750_v44 = vld [vmem:[#allocation10] sm:$0xff] }
  0x27   :  { %v765_v45 = vld [vmem:[#allocation11 + $0x38] sm:$0xff]  ;;  %v764_v46 = vld [vmem:[#allocation11 + $0x30] sm:$0xff]  ;;  %v763_v47 = vld [vmem:[#allocation11 + $0x28] sm:$0xff] }
  0x28   :  { %203 = vmatpush.bf16.msra.mxu0 %v730_v6  ;;  %v762_v48 = vld [vmem:[#allocation11 + $0x20] sm:$0xff]  ;;  %v761_v49 = vld [vmem:[#allocation11 + $0x18] sm:$0xff]  ;;  %v760_v50 = vld [vmem:[#allocation11 + $0x10] sm:$0xff] }
  0x29   :  { %286 = vmatpush.bf16.msra.mxu1 %v738_v7  ;;  %450 = vmatpush.bf16.msra.mxu3 %v756_v32  ;;  %v777_v51 = vld [vmem:[%s1084_s6] ss:$0 sm:$0xff]  ;;  %v759_v57 = vld [vmem:[#allocation11 + $0x8] sm:$0xff]  ;;  %v758_v58 = vld [vmem:[#allocation11] sm:$0xff] }
  0x2a   :  { %368 = vmatpush.bf16.msra.mxu2 %v747_v19  ;;  %v778_v59 = vld [vmem:[%s1086_s8] ss:$0 sm:$0xff] }
  0x2b   :  { %v779_v1 = vld [vmem:[%s1088_s10] ss:$0 sm:$0xff] }
  0x2c   :  { %204 = vmatpush.bf16.msra.mxu0 %v729_v8 }
  0x2d   :  { %287 = vmatpush.bf16.msra.mxu1 %v737_v9  ;;  %451 = vmatpush.bf16.msra.mxu3 %v755_v33 }
  0x2e   :  { %369 = vmatpush.bf16.msra.mxu2 %v746_v20 }
  0x30   :  { %205 = vmatpush.bf16.msra.mxu0 %v728_v10 }
  0x31   :  { %288 = vmatpush.bf16.msra.mxu1 %v736_v11  ;;  %452 = vmatpush.bf16.msra.mxu3 %v754_v34 }
  0x32   :  { %370 = vmatpush.bf16.msra.mxu2 %v745_v21 }
  0x34   :  { %206 = vmatpush.bf16.msra.mxu0 %v727_v12 }
  0x35   :  { %289 = vmatpush.bf16.msra.mxu1 %v735_v15  ;;  %453 = vmatpush.bf16.msra.mxu3 %v753_v35 }
  0x36   :  { %371 = vmatpush.bf16.msra.mxu2 %v744_v22 }
  0x38   :  { %207 = vmatpush.bf16.msra.mxu0 %v726_v13 }
  0x39   :  { %290 = vmatpush.bf16.msra.mxu1 %v734_v16  ;;  %454 = vmatpush.bf16.msra.mxu3 %v752_v36 }
  0x3a   :  { %372 = vmatpush.bf16.msra.mxu2 %v743_v29 }
  0x3b   :  { %208 = vmatmul.bf16.vlgmr.msra.gmra.mxu0 %v131_v14 }
  0x3c   :  { %532 = vmatpush.bf16.msrb.mxu0 %v765_v45 }
  0x3d   :  { %455 = vmatpush.bf16.msra.mxu3 %v751_v43 }
  0x3e   :  { %373 = vmatpush.bf16.msra.mxu2 %v742_v30 }
  0x40   :  { %533 = vmatpush.bf16.msrb.mxu0 %v764_v46 }
  0x41   :  { %456 = vmatpush.bf16.msra.mxu3 %v750_v44 }
  0x44   :  { %534 = vmatpush.bf16.msrb.mxu0 %v763_v47 }
  0x48   :  { %535 = vmatpush.bf16.msrb.mxu0 %v762_v48 }
  0x4c   :  { %536 = vmatpush.bf16.msrb.mxu0 %v761_v49 }
  0x50   :  { %537 = vmatpush.bf16.msrb.mxu0 %v760_v50 }
  0x54   :  { %538 = vmatpush.bf16.msrb.mxu0 %v759_v57 }
  0x58   :  { %539 = vmatpush.bf16.msrb.mxu0 %v758_v58 }
  0xb8   :  { %v209_v24 = vpop.f32.mrf.mxu0 }
  0xb9   :  { %v210_v25 = vadd.f32 %v775_v23, %v209_v24 }
  0xbb   :  { %v213_v26 = vmax.f32 %v210_v25, 0.0 }
  0xbd   :  { %v214_v27 = vpack.c.bf16 %v213_v26, %v213_v26 }
  0xbf   :  { %291 = vmatmul.bf16.vlgmr.msra.gmra.mxu1 %v214_v27 }
  0xc0   :  { %v211_v28 = vpop.f32.mrf.mxu0 }
 0x13c   :  { %v292_v38 = vpop.f32.mrf.mxu1 }
 0x13d   :  { %v293_v39 = vadd.f32 %v776_v37, %v292_v38 }
 0x13f   :  { %v296_v40 = vmax.f32 %v293_v39, 0.0 }
 0x141   :  { %v297_v41 = vpack.c.bf16 %v296_v40, %v296_v40 }
 0x143   :  { %374 = vmatmul.bf16.vlgmr.msra.gmra.mxu2 %v297_v41 }
 0x144   :  { %v294_v42 = vpop.f32.mrf.mxu1 }
 0x1c6   :  { %v375_v52 = vpop.f32.mrf.mxu2 }
 0x1c7   :  { %v376_v53 = vadd.f32 %v777_v51, %v375_v52 }
 0x1c9   :  { %v379_v54 = vmax.f32 %v376_v53, 0.0 }
 0x1cb   :  { %v380_v55 = vpack.c.bf16 %v379_v54, %v379_v54 }
 0x1cd   :  { %457 = vmatmul.bf16.vlgmr.msra.gmra.mxu3 %v380_v55 }
 0x1ce   :  { %v377_v56 = vpop.f32.mrf.mxu2 }
 0x250   :  { %v458_v60 = vpop.f32.mrf.mxu3 }
 0x251   :  { %v459_v61 = vadd.f32 %v778_v59, %v458_v60 }
 0x253   :  { %v462_v62 = vmax.f32 %v459_v61, 0.0 }
 0x255   :  { %v463_v63 = vpack.c.bf16 %v462_v62, %v462_v62 }
 0x257   :  { %540 = vmatmul.bf16.vlgmr.msrb.gmra.mxu0 %v463_v63 }
 0x258   :  { %v460_v0 = vpop.f32.mrf.mxu3 }
 0x2d4   :  { %v541_v2 = vpop.f32.mrf.mxu0 }
 0x2d5   :  { %v542_v3 = vadd.f32 %v779_v1, %v541_v2 }
 0x2d7   :  { %545 = vst [vmem:[#allocation13] sm:$0xff] %v542_v3 }
 0x2d8   :  { %556 = dma.vmem_to_hbm [thread:$0]  %s552_s5, 128, %s554_s14, [#allocation4]  }
 0x2dc   :  { %v543_v4 = vpop.f32.mrf.mxu0 }
 0x2dd   :  { %956 = dma.done.wait [#allocation4], 128  }
 0x2de   :  { %957 = vsyncadd [#allocation4], 4294967168 }
 0x2df   :  { %561 = vsyncpa [#allocation3], 1 }
 0x2e0   :  { %562 = vsyncpa [#allocation6], 1 }
 0x2e1   :  { %563 = vsyncpa [#allocation9], 1 }
 0x2e2   :  { %564 = vsyncpa [#allocation12], 1 }
 0x2e3   :  { %565 = vsyncpa [#allocation4], 1 }

</bundles_post_ra>
